<compile_context>
chip_gen: v5e
topology: v5e:2x2
jax: 0.10.0
libtpu: 0.0.40
codegen_flags: <defaults>
</compile_context>

<pallas_src>
import functools

import jax
import jax.numpy as jnp
from jax.experimental import pallas as pl
from jax.experimental.pallas import tpu as pltpu

_LANE = 128     # vreg lane width (last dim)
_SUBLANE = 8    # vreg sublane width for f32 (second-to-last dim)
_MAX_TM = 256   # max batch tile: fills the 256-deep MXU on v6e/v7x


def _round_up(n, m):
    return ((n + m - 1) // m) * m


def _make_mlp_kernel(num_layers):
    """Builds kernel(x_ref, w1, b1, ..., wN, bN, o_ref) for the fused MLP."""

    def kernel(*refs):
        x_ref = refs[0]
        o_ref = refs[-1]
        # Activation carried layer-to-layer in vregs/VMEM; never touches HBM.
        h = x_ref[...].astype(jnp.float32)
        # Static Python loop -> fully unrolled at trace time (refs differ per
        # layer, so a dynamic loop is not an option).  Each layer is one MXU
        # matmul + VPU bias-add/ReLU.
        for l in range(num_layers):
            w_ref = refs[1 + 2 * l]
            b_ref = refs[2 + 2 * l]
            lhs = h.astype(w_ref.dtype)          # bf16 path if weights are bf16
            y = jnp.dot(lhs, w_ref[...], preferred_element_type=jnp.float32)
            y = y + b_ref[...].astype(jnp.float32)   # [1, Np] broadcast, f32
            h = jnp.maximum(y, 0.0)
        o_ref[...] = h.astype(o_ref.dtype)

    return kernel


def init_dnn_params(key, hidden_units):
    """Mimics PyTorch nn.Linear init; weight stored as [in, out]."""
    params = []
    for i in range(len(hidden_units) - 1):
        in_f, out_f = hidden_units[i], hidden_units[i + 1]
        key, kw, kb = jax.random.split(key, 3)
        bound = 1.0 / (in_f ** 0.5)
        w = jax.random.uniform(kw, (in_f, out_f), jnp.float32, -bound, bound)
        b = jax.random.uniform(kb, (out_f,), jnp.float32, -bound, bound)
        params.append((w, b))
    return params


def pad_params(params, compute_dtype=jnp.float32):
    """Zero-pad every layer's weight/bias so each feature dim is a multiple
    of 128 lanes.  Done once, outside the hot path.

    compute_dtype: jnp.float32 (default) or jnp.bfloat16.  bf16 weights halve
    the HBM->VMEM DMA bytes and use the MXU's native input format at real
    widths; accumulation stays f32 in-kernel either way.  Biases stay f32.
    """
    padded = []
    for w, b in params:
        in_f, out_f = w.shape
        ip = _round_up(in_f, _LANE)
        op = _round_up(out_f, _LANE)
        w_pad = (jnp.zeros((ip, op), jnp.float32).at[:in_f, :out_f].set(w)
                 .astype(compute_dtype))
        b_pad = jnp.zeros((1, op), jnp.float32).at[0, :out_f].set(b)
        padded.append((w_pad, b_pad))
    return padded


@functools.partial(jax.jit, static_argnames=("out_features",))
def dnn_forward(x, padded_params, out_features):
    """Fused forward: relu(...relu(x @ W1 + b1)... @ Wn + bn)."""
    B, in_f = x.shape
    in_pad = padded_params[0][0].shape[0]
    out_pad = padded_params[-1][0].shape[1]

    # Batch tile: multiple of the f32 sublane width, capped at 256 so a real
    # batch fills the MXU; grid splits the remaining batch (parallel axis ->
    # sharded across v7x's 2 TensorCores).
    tm = min(_round_up(max(B, _SUBLANE), _SUBLANE), _MAX_TM)
    b_pad = _round_up(max(B, _SUBLANE), tm)
    num_tiles = b_pad // tm

    # Pad batch (sublane axis) and input features (lane axis) with zeros.
    # Negligible at small batch; padded rows/lanes are numerically inert.
    x_pad = jnp.zeros((b_pad, in_pad), jnp.float32).at[:B, :in_f].set(x)

    args = [x_pad]
    in_specs = [pl.BlockSpec((tm, in_pad), lambda i: (i, 0))]
    flops = 0
    weight_bytes = 0
    for w_pad, b_vec in padded_params:
        kp, np_ = w_pad.shape
        args.append(w_pad)
        args.append(b_vec)
        # Grid-invariant blocks: fetched once, resident across batch tiles.
        in_specs.append(pl.BlockSpec((kp, np_), lambda i: (0, 0)))
        in_specs.append(pl.BlockSpec((1, np_), lambda i: (0, 0)))
        flops += 2 * b_pad * kp * np_
        weight_bytes += (w_pad.size * w_pad.dtype.itemsize
                         + b_vec.size * b_vec.dtype.itemsize)

    io_bytes = (b_pad * in_pad + b_pad * out_pad) * 4
    tile_io_bytes = (tm * in_pad + tm * out_pad) * 4
    # Weights are single-buffered (grid-invariant); x/out tiles double-buffer.
    vmem_need = weight_bytes + 2 * tile_io_bytes + (1 << 20)
    vmem_limit = int(min(max(vmem_need, 4 << 20), 64 << 20))

    out = pl.pallas_call(
        _make_mlp_kernel(len(padded_params)),
        out_shape=jax.ShapeDtypeStruct((b_pad, out_pad), jnp.float32),
        grid=(num_tiles,),
        in_specs=in_specs,
        out_specs=pl.BlockSpec((tm, out_pad), lambda i: (i, 0)),
        compiler_params=pltpu.CompilerParams(
            dimension_semantics=("parallel",),
            vmem_limit_bytes=vmem_limit,
        ),
        cost_estimate=pl.CostEstimate(
            flops=flops,
            transcendentals=0,
            bytes_accessed=weight_bytes + io_bytes,
        ),
    )(*args)

    # Slice back to the logical [batch, out_features] result.
    return out[:B, :out_features]

# TODO(synk): at real widths (>=1024) and deep nets, switch weights to
# memory_space=pl.ANY with a 2-slot VMEM scratch + pltpu.make_async_copy
# double buffer (prefetch layer l+1 while computing layer l) and add a K/N
# tiled grid with an f32 accumulator scratch, so the whole-weights-in-VMEM
# footprint stays inside v7x's 64 MiB.


if __name__ == "__main__":
    key = jax.random.PRNGKey(0)
    hidden_units = [32, 64, 32, 16]   # DNN(hidden_units=[32, 64, 32, 16])
    batch = 2

    key, kx = jax.random.split(key)
    x = jax.random.normal(kx, (batch, hidden_units[0]), jnp.float32)

    params = init_dnn_params(key, hidden_units)
    padded_params = pad_params(params)   # f32 at toy widths; bf16 gated on width

    out = dnn_forward(x, padded_params, hidden_units[-1])
    jax.block_until_ready(out)

    # sanity: shape and ReLU non-negativity
    assert out.shape == (batch, hidden_units[-1])
    assert bool(jnp.all(out >= 0.0))

    # reference check against plain JAX (unpadded weights)
    ref = x
    for w, b in params:
        ref = jnp.maximum(ref @ w + b, 0.0)
    assert bool(jnp.allclose(out, ref, atol=1e-5, rtol=1e-5)), float(
        jnp.max(jnp.abs(out - ref)))

    print("KERNEL_OK")
</pallas_src>

<mosaic_0001>
module attributes {stable_mosaic.version = 11 : i64} {
  func.func @kernel(%arg0: i32, %arg1: memref<8x128xf32, #tpu.memory_space<vmem>>, %arg2: memref<128x128xf32, #tpu.memory_space<vmem>>, %arg3: memref<1x128xf32, #tpu.memory_space<vmem>>, %arg4: memref<128x128xf32, #tpu.memory_space<vmem>>, %arg5: memref<1x128xf32, #tpu.memory_space<vmem>>, %arg6: memref<128x128xf32, #tpu.memory_space<vmem>>, %arg7: memref<1x128xf32, #tpu.memory_space<vmem>>, %arg8: memref<8x128xf32, #tpu.memory_space<vmem>>) attributes {dimension_semantics = [#tpu.dimension_semantics<parallel>], iteration_bounds = array<i64: 1>, scalar_prefetch = 0 : i64, scratch_operands = 0 : i64, tpu.core_type = #tpu.core_type<tc>, window_params = [{transform_indices = @transform_0, window_bounds = array<i64: 8, 128>}, {pipeline_mode = #tpu.pipeline_mode<synchronous>, transform_indices = @transform_1, window_bounds = array<i64: 128, 128>}, {pipeline_mode = #tpu.pipeline_mode<synchronous>, transform_indices = @transform_2, window_bounds = array<i64: 1, 128>}, {pipeline_mode = #tpu.pipeline_mode<synchronous>, transform_indices = @transform_3, window_bounds = array<i64: 128, 128>}, {pipeline_mode = #tpu.pipeline_mode<synchronous>, transform_indices = @transform_4, window_bounds = array<i64: 1, 128>}, {pipeline_mode = #tpu.pipeline_mode<synchronous>, transform_indices = @transform_5, window_bounds = array<i64: 128, 128>}, {pipeline_mode = #tpu.pipeline_mode<synchronous>, transform_indices = @transform_6, window_bounds = array<i64: 1, 128>}, {transform_indices = @transform_7, window_bounds = array<i64: 8, 128>}]} {
    %c0 = arith.constant 0 : index
    %c0_0 = arith.constant 0 : index
    %0 = vector.load %arg1[%c0, %c0_0] : memref<8x128xf32, #tpu.memory_space<vmem>>, vector<8x128xf32>
    %c0_1 = arith.constant 0 : index
    %c0_2 = arith.constant 0 : index
    %1 = vector.load %arg2[%c0_1, %c0_2] : memref<128x128xf32, #tpu.memory_space<vmem>>, vector<128x128xf32>
    %cst = arith.constant dense<0.000000e+00> : vector<8x128xf32>
    %2 = tpu.matmul %0, %1, %cst {dimension_numbers = #tpu.dot_dimension_numbers<[1], [0], [0], [1], [0, 0, 1, 1], [], []>} : vector<8x128xf32>, vector<128x128xf32>, vector<8x128xf32> -> vector<8x128xf32>
    %c0_3 = arith.constant 0 : index
    %c0_4 = arith.constant 0 : index
    %3 = vector.load %arg3[%c0_3, %c0_4] : memref<1x128xf32, #tpu.memory_space<vmem>>, vector<1x128xf32>
    %4 = vector.broadcast %3 : vector<1x128xf32> to vector<8x128xf32>
    %5 = arith.addf %2, %4 : vector<8x128xf32>
    %cst_5 = arith.constant 0.000000e+00 : f32
    %6 = vector.broadcast %cst_5 : f32 to vector<8x128xf32>
    %7 = arith.maximumf %5, %6 : vector<8x128xf32>
    %c0_6 = arith.constant 0 : index
    %c0_7 = arith.constant 0 : index
    %8 = vector.load %arg4[%c0_6, %c0_7] : memref<128x128xf32, #tpu.memory_space<vmem>>, vector<128x128xf32>
    %cst_8 = arith.constant dense<0.000000e+00> : vector<8x128xf32>
    %9 = tpu.matmul %7, %8, %cst_8 {dimension_numbers = #tpu.dot_dimension_numbers<[1], [0], [0], [1], [0, 0, 1, 1], [], []>} : vector<8x128xf32>, vector<128x128xf32>, vector<8x128xf32> -> vector<8x128xf32>
    %c0_9 = arith.constant 0 : index
    %c0_10 = arith.constant 0 : index
    %10 = vector.load %arg5[%c0_9, %c0_10] : memref<1x128xf32, #tpu.memory_space<vmem>>, vector<1x128xf32>
    %11 = vector.broadcast %10 : vector<1x128xf32> to vector<8x128xf32>
    %12 = arith.addf %9, %11 : vector<8x128xf32>
    %cst_11 = arith.constant 0.000000e+00 : f32
    %13 = vector.broadcast %cst_11 : f32 to vector<8x128xf32>
    %14 = arith.maximumf %12, %13 : vector<8x128xf32>
    %c0_12 = arith.constant 0 : index
    %c0_13 = arith.constant 0 : index
    %15 = vector.load %arg6[%c0_12, %c0_13] : memref<128x128xf32, #tpu.memory_space<vmem>>, vector<128x128xf32>
    %cst_14 = arith.constant dense<0.000000e+00> : vector<8x128xf32>
    %16 = tpu.matmul %14, %15, %cst_14 {dimension_numbers = #tpu.dot_dimension_numbers<[1], [0], [0], [1], [0, 0, 1, 1], [], []>} : vector<8x128xf32>, vector<128x128xf32>, vector<8x128xf32> -> vector<8x128xf32>
    %c0_15 = arith.constant 0 : index
    %c0_16 = arith.constant 0 : index
    %17 = vector.load %arg7[%c0_15, %c0_16] : memref<1x128xf32, #tpu.memory_space<vmem>>, vector<1x128xf32>
    %18 = vector.broadcast %17 : vector<1x128xf32> to vector<8x128xf32>
    %19 = arith.addf %16, %18 : vector<8x128xf32>
    %cst_17 = arith.constant 0.000000e+00 : f32
    %20 = vector.broadcast %cst_17 : f32 to vector<8x128xf32>
    %21 = arith.maximumf %19, %20 : vector<8x128xf32>
    %c0_18 = arith.constant 0 : index
    %c0_19 = arith.constant 0 : index
    %22 = vector.load %arg8[%c0_18, %c0_19] : memref<8x128xf32, #tpu.memory_space<vmem>>, vector<8x128xf32>
    tpu.vector_store %arg8[%c0_18, %c0_19], %21 {strides = array<i32>} : memref<8x128xf32, #tpu.memory_space<vmem>>, vector<8x128xf32>,
    return
  }
  func.func @transform_0(%arg0: i32) -> (i32, i32) {
    %c0_i32 = arith.constant 0 : i32
    %c0_i32_0 = arith.constant 0 : i32
    return %arg0, %c0_i32 : i32, i32
  }
  func.func @transform_1(%arg0: i32) -> (i32, i32) {
    %c0_i32 = arith.constant 0 : i32
    %c0_i32_0 = arith.constant 0 : i32
    %c0_i32_1 = arith.constant 0 : i32
    return %c0_i32, %c0_i32_0 : i32, i32
  }
  func.func @transform_2(%arg0: i32) -> (i32, i32) {
    %c0_i32 = arith.constant 0 : i32
    %c0_i32_0 = arith.constant 0 : i32
    %c0_i32_1 = arith.constant 0 : i32
    return %c0_i32, %c0_i32_0 : i32, i32
  }
  func.func @transform_3(%arg0: i32) -> (i32, i32) {
    %c0_i32 = arith.constant 0 : i32
    %c0_i32_0 = arith.constant 0 : i32
    %c0_i32_1 = arith.constant 0 : i32
    return %c0_i32, %c0_i32_0 : i32, i32
  }
  func.func @transform_4(%arg0: i32) -> (i32, i32) {
    %c0_i32 = arith.constant 0 : i32
    %c0_i32_0 = arith.constant 0 : i32
    %c0_i32_1 = arith.constant 0 : i32
    return %c0_i32, %c0_i32_0 : i32, i32
  }
  func.func @transform_5(%arg0: i32) -> (i32, i32) {
    %c0_i32 = arith.constant 0 : i32
    %c0_i32_0 = arith.constant 0 : i32
    %c0_i32_1 = arith.constant 0 : i32
    return %c0_i32, %c0_i32_0 : i32, i32
  }
  func.func @transform_6(%arg0: i32) -> (i32, i32) {
    %c0_i32 = arith.constant 0 : i32
    %c0_i32_0 = arith.constant 0 : i32
    %c0_i32_1 = arith.constant 0 : i32
    return %c0_i32, %c0_i32_0 : i32, i32
  }
  func.func @transform_7(%arg0: i32) -> (i32, i32) {
    %c0_i32 = arith.constant 0 : i32
    %c0_i32_0 = arith.constant 0 : i32
    return %arg0, %c0_i32 : i32, i32
  }
}

</mosaic_0001>

<bundles_post_ra>
// kernel: dnn_forward.1
= control target key start
LH: loop header
LB: loop body
LE: loop exit
PB: predicated region body
PF: predicated region fallthrough
CT: control target
= control target key end

     0   :  { %12 = vsyncpa [#allocation3], 0  ;;  %s357_s0 = inlined_call_operand.vmem [shape: f32[8,128], index: 0, kind: input, shape index: {}]   ;;  %s358_s1 = inlined_call_operand.hbm [shape: f32[128,128], index: 1, kind: input, shape index: {}]   ;;  %s359_s2 = inlined_call_operand.vmem [shape: f32[1,128], index: 2, kind: input, shape index: {}]   ;;  %s360_s3 = inlined_call_operand.hbm [shape: f32[128,128], index: 3, kind: input, shape index: {}]   ;;  %s361_s4 = inlined_call_operand.vmem [shape: f32[1,128], index: 4, kind: input, shape index: {}]   ;;  %s362_s5 = inlined_call_operand.hbm [shape: f32[128,128], index: 5, kind: input, shape index: {}]   ;;  %s363_s6 = inlined_call_operand.vmem [shape: f32[1,128], index: 6, kind: input, shape index: {}]   ;;  %s364_s7 = inlined_call_operand.vmem [shape: f32[8,128], index: 7, kind: output, shape index: {}]  }
   0x1   :  { %13 = vsyncpa [#allocation5], 0  ;;  %s35_s26 = sshll.u32 %s360_s3, 4  ;;  %s288_s27 = smov [#allocation4]   ;;  %s36_s26 = int_to_ptr.hbm [resolvable:$true] %s35_s26 }
   0x2   :  { %s37_s28 = sshll.u32 %s288_s27, 4  ;;  %s20_s8 = sshll.u32 %s358_s1, 4  ;;  %s38_s28 = int_to_ptr.vmem [resolvable:$true] %s37_s28  ;;  %s21_s8 = int_to_ptr.hbm [resolvable:$true] %s20_s8 }
   0x3   :  { %s289_s9 = smov 128   ;;  %s290_s10 = smov 8  }
   0x4   :  { %43 = dma.hbm_to_vmem [thread:$0]  %s36_s26, 2048, %s38_s28, [#allocation5], %s289_s9, %s289_s9, %s290_s10  }
   0x5   :  { %s291_s11 = smov [#allocation2]   ;;  %s50_s15 = sshll.u32 %s362_s5, 4  ;;  %s51_s15 = int_to_ptr.hbm [resolvable:$true] %s50_s15 }
   0x6   :  { %s22_s12 = sshll.u32 %s291_s11, 4  ;;  %s292_s3 = smov [#allocation6]   ;;  %s23_s12 = int_to_ptr.vmem [resolvable:$true] %s22_s12 }
   0x7   :  { %28 = dma.hbm_to_vmem [thread:$0]  %s21_s8, 2048, %s23_s12, [#allocation3], %s289_s9, %s289_s9, %s290_s10  }
   0x8   :  { %s52_s16 = sshll.u32 %s292_s3, 4  ;;  %s53_s16 = int_to_ptr.vmem [resolvable:$true] %s52_s16 }
   0x9   :  { %58 = dma.hbm_to_vmem [thread:$0]  %s51_s15, 2048, %s53_s16, [#allocation5], %s289_s9, %s289_s9, %s290_s10  }
   0xa   :  { %284 = dma.done.wait [#allocation3], 2048  }
   0xb   :  { %285 = vsyncadd [#allocation3], 4294965248 }
   0xc   :  { %286 = dma.done.wait [#allocation5], 4096  }
   0xd   :  { %287 = vsyncadd [#allocation5], 4294963200  ;;  %v89_v0 = vld [vmem:[#allocation2 + $0x78] sm:$0xff]  ;;  %v88_v1 = vld [vmem:[#allocation2 + $0x70] sm:$0xff] }
   0xe   :  { %94 = vmatpush.msra.mxu0 %v89_v0  ;;  %v87_v2 = vld [vmem:[#allocation2 + $0x68] sm:$0xff]  ;;  %v86_v3 = vld [vmem:[#allocation2 + $0x60] sm:$0xff]  ;;  %v130_v4 = vld [vmem:[#allocation4 + $0x78] sm:$0xff] }
   0xf   :  { %v85_v5 = vld [vmem:[#allocation2 + $0x58] sm:$0xff]  ;;  %135 = vmatpush.msra.mxu1 %v130_v4  ;;  %v129_v6 = vld [vmem:[#allocation4 + $0x70] sm:$0xff]  ;;  %v128_v7 = vld [vmem:[#allocation4 + $0x68] sm:$0xff] }
  0x10   :  { %95 = vmatpush.msra.mxu0 %v88_v1  ;;  %v84_v8 = vld [vmem:[#allocation2 + $0x50] sm:$0xff]  ;;  %v127_v9 = vld [vmem:[#allocation4 + $0x60] sm:$0xff]  ;;  %v83_v10 = vld [vmem:[#allocation2 + $0x48] sm:$0xff] }
  0x11   :  { %136 = vmatpush.msra.mxu1 %v129_v6  ;;  %v126_v11 = vld [vmem:[#allocation4 + $0x58] sm:$0xff]  ;;  %v82_v12 = vld [vmem:[#allocation2 + $0x40] sm:$0xff]  ;;  %v125_v13 = vld [vmem:[#allocation4 + $0x50] sm:$0xff] }
  0x12   :  { %96 = vmatpush.msra.mxu0 %v87_v2  ;;  %v81_v14 = vld [vmem:[#allocation2 + $0x38] sm:$0xff]  ;;  %v124_v15 = vld [vmem:[#allocation4 + $0x48] sm:$0xff]  ;;  %v80_v16 = vld [vmem:[#allocation2 + $0x30] sm:$0xff] }
  0x13   :  { %137 = vmatpush.msra.mxu1 %v128_v7  ;;  %v123_v17 = vld [vmem:[#allocation4 + $0x40] sm:$0xff]  ;;  %v79_v18 = vld [vmem:[#allocation2 + $0x28] sm:$0xff]  ;;  %v122_v19 = vld [vmem:[#allocation4 + $0x38] sm:$0xff] }
  0x14   :  { %97 = vmatpush.msra.mxu0 %v86_v3  ;;  %v78_v20 = vld [vmem:[#allocation2 + $0x20] sm:$0xff]  ;;  %v121_v21 = vld [vmem:[#allocation4 + $0x30] sm:$0xff]  ;;  %v77_v22 = vld [vmem:[#allocation2 + $0x18] sm:$0xff] }
  0x15   :  { %138 = vmatpush.msra.mxu1 %v127_v9  ;;  %v120_v23 = vld [vmem:[#allocation4 + $0x28] sm:$0xff]  ;;  %v76_v24 = vld [vmem:[#allocation2 + $0x10] sm:$0xff]  ;;  %v119_v25 = vld [vmem:[#allocation4 + $0x20] sm:$0xff] }
  0x16   :  { %98 = vmatpush.msra.mxu0 %v85_v5  ;;  %v75_v26 = vld [vmem:[#allocation2 + $0x8] sm:$0xff]  ;;  %v118_v27 = vld [vmem:[#allocation4 + $0x18] sm:$0xff]  ;;  %v74_v28 = vld [vmem:[#allocation2] sm:$0xff] }
  0x17   :  { %139 = vmatpush.msra.mxu1 %v126_v11  ;;  %v73_v29 = vld [vmem:[%s357_s0] sm:$0xff]  ;;  %v117_v30 = vld [vmem:[#allocation4 + $0x10] sm:$0xff]  ;;  %v116_v31 = vld [vmem:[#allocation4 + $0x8] sm:$0xff] }
  0x18   :  { %99 = vmatpush.msra.mxu0 %v84_v8  ;;  %v115_v32 = vld [vmem:[#allocation4] sm:$0xff]  ;;  %v171_v33 = vld [vmem:[#allocation6 + $0x78] sm:$0xff]  ;;  %v170_v34 = vld [vmem:[#allocation6 + $0x70] sm:$0xff] }
  0x19   :  { %140 = vmatpush.msra.mxu1 %v125_v13  ;;  %176 = vmatpush.msra.mxu2 %v171_v33  ;;  %v169_v35 = vld [vmem:[#allocation6 + $0x68] sm:$0xff]  ;;  %v168_v36 = vld [vmem:[#allocation6 + $0x60] sm:$0xff]  ;;  %v167_v37 = vld [vmem:[#allocation6 + $0x58] sm:$0xff] }
  0x1a   :  { %100 = vmatpush.msra.mxu0 %v83_v10  ;;  %v166_v38 = vld [vmem:[#allocation6 + $0x50] sm:$0xff]  ;;  %v165_v39 = vld [vmem:[#allocation6 + $0x48] sm:$0xff]  ;;  %v164_v40 = vld [vmem:[#allocation6 + $0x40] sm:$0xff] }
  0x1b   :  { %141 = vmatpush.msra.mxu1 %v124_v15  ;;  %177 = vmatpush.msra.mxu2 %v170_v34  ;;  %v163_v41 = vld [vmem:[#allocation6 + $0x38] sm:$0xff]  ;;  %v162_v42 = vld [vmem:[#allocation6 + $0x30] sm:$0xff]  ;;  %v161_v43 = vld [vmem:[#allocation6 + $0x28] sm:$0xff] }
  0x1c   :  { %101 = vmatpush.msra.mxu0 %v82_v12  ;;  %v160_v44 = vld [vmem:[#allocation6 + $0x20] sm:$0xff]  ;;  %v159_v45 = vld [vmem:[#allocation6 + $0x18] sm:$0xff]  ;;  %v158_v50 = vld [vmem:[#allocation6 + $0x10] sm:$0xff] }
  0x1d   :  { %142 = vmatpush.msra.mxu1 %v123_v17  ;;  %178 = vmatpush.msra.mxu2 %v169_v35  ;;  %v209_v46 = vld [vmem:[%s359_s2] ss:$0 sm:$0xff]  ;;  %v157_v51 = vld [vmem:[#allocation6 + $0x8] sm:$0xff] }
  0x1e   :  { %102 = vmatpush.msra.mxu0 %v81_v14  ;;  %v156_v52 = vld [vmem:[#allocation6] sm:$0xff] }
  0x1f   :  { %143 = vmatpush.msra.mxu1 %v122_v19  ;;  %179 = vmatpush.msra.mxu2 %v168_v36  ;;  %v210_v53 = vld [vmem:[%s361_s4] ss:$0 sm:$0xff] }
  0x20   :  { %103 = vmatpush.msra.mxu0 %v80_v16  ;;  %v211_v57 = vld [vmem:[%s363_s6] ss:$0 sm:$0xff] }
  0x21   :  { %144 = vmatpush.msra.mxu1 %v121_v21  ;;  %180 = vmatpush.msra.mxu2 %v167_v37 }
  0x22   :  { %104 = vmatpush.msra.mxu0 %v79_v18 }
  0x23   :  { %145 = vmatpush.msra.mxu1 %v120_v23  ;;  %181 = vmatpush.msra.mxu2 %v166_v38 }
  0x24   :  { %105 = vmatpush.msra.mxu0 %v78_v20 }
  0x25   :  { %146 = vmatpush.msra.mxu1 %v119_v25  ;;  %182 = vmatpush.msra.mxu2 %v165_v39 }
  0x26   :  { %106 = vmatpush.msra.mxu0 %v77_v22 }
  0x27   :  { %147 = vmatpush.msra.mxu1 %v118_v27  ;;  %183 = vmatpush.msra.mxu2 %v164_v40 }
  0x28   :  { %107 = vmatpush.msra.mxu0 %v76_v24 }
  0x29   :  { %148 = vmatpush.msra.mxu1 %v117_v30  ;;  %184 = vmatpush.msra.mxu2 %v163_v41 }
  0x2a   :  { %108 = vmatpush.msra.mxu0 %v75_v26 }
  0x2b   :  { %149 = vmatpush.msra.mxu1 %v116_v31  ;;  %185 = vmatpush.msra.mxu2 %v162_v42 }
  0x2c   :  { %109 = vmatpush.msra.mxu0 %v74_v28 }
  0x2d   :  { %110 = vmatmul.f32.vlgmr.msra.gmra.mxu0 %v73_v29  ;;  %150 = vmatpush.msra.mxu1 %v115_v32 }
  0x2e   :  { %186 = vmatpush.msra.mxu2 %v161_v43 }
  0x30   :  { %187 = vmatpush.msra.mxu2 %v160_v44 }
  0x32   :  { %188 = vmatpush.msra.mxu2 %v159_v45 }
  0x34   :  { %189 = vmatpush.msra.mxu2 %v158_v50 }
  0x36   :  { %190 = vmatpush.msra.mxu2 %v157_v51 }
  0x38   :  { %191 = vmatpush.msra.mxu2 %v156_v52 }
  0xaa   :  { %v111_v47 = vpop.f32.mrf.mxu0 }
  0xab   :  { %v112_v48 = vadd.f32 %v209_v46, %v111_v47 }
  0xad   :  { %v114_v49 = vmax.f32 %v112_v48, 0.0 }
  0xaf   :  { %151 = vmatmul.f32.vlgmr.msra.gmra.mxu1 %v114_v49 }
 0x12c   :  { %v152_v54 = vpop.f32.mrf.mxu1 }
 0x12d   :  { %v153_v55 = vadd.f32 %v210_v53, %v152_v54 }
 0x12f   :  { %v155_v56 = vmax.f32 %v153_v55, 0.0 }
 0x131   :  { %192 = vmatmul.f32.vlgmr.msra.gmra.mxu2 %v155_v56 }
 0x1b4   :  { %v193_v58 = vpop.f32.mrf.mxu2 }
 0x1b5   :  { %v194_v59 = vadd.f32 %v211_v57, %v193_v58 }
 0x1b7   :  { %v196_v60 = vmax.f32 %v194_v59, 0.0 }
 0x1b9   :  { %197 = vst [vmem:[%s364_s7] sm:$0xff] %v196_v60 }
 0x1ba   :  { %202 = vsyncpa [#allocation3], 1 }
 0x1bb   :  { %203 = vsyncpa [#allocation5], 1 }

</bundles_post_ra>
